<compile_context>
chip_gen: v7x
topology: tpu7x:2x2x1
jax: 0.10.0
libtpu: 0.0.40
codegen_flags: <defaults>
</compile_context>

<pallas_src>
import functools

import jax
import jax.numpy as jnp
from jax import lax
from jax.experimental import pallas as pl
from jax.experimental.pallas import tpu as pltpu


_VMEM_LIMIT_BYTES = 64 * 1024 * 1024      # <= v7x physical VMEM; > v5e/v6e scoped defaults
_VMEM_BUDGET_BYTES = 36 * 1024 * 1024     # target working set; leaves pipeline headroom
_RESIDENT_W_MAX_BYTES = 8 * 1024 * 1024   # keep W [C,C] f32 VMEM-resident up to ~1.4K classes


def _smooth_ce_kernel(preds_ref, target_ref, w_ref, out_ref, *,
                      epsilon, n_total, block_rows, resident_w):
    i = pl.program_id(0)

    preds = preds_ref[...].astype(jnp.float32)      # [TN, C]
    tgt = target_ref[...]                           # [TN, 1] int32 class ids
    tn, c = preds.shape

    # Row-wise log-sum-exp (only transcendental work in the hot loop -> EUP slot).
    row_max = jnp.max(preds, axis=-1, keepdims=True)                          # [TN, 1]
    lse = jnp.log(jnp.sum(jnp.exp(preds - row_max), axis=-1, keepdims=True))  # [TN, 1]

    # one-hot(target) from a lane iota (exact in any precision).
    class_ids = lax.broadcasted_iota(jnp.int32, (tn, c), 1)
    onehot = (class_ids == tgt).astype(jnp.float32)                           # [TN, C]

    if resident_w:
        # w_ref is the VMEM-resident [C, C] softmax(-gamma*matrix) (constant index_map,
        # DMA'd once).  Row gather W[target] == one-hot @ W on the otherwise-idle MXU,
        # so no per-sample [N, C] weight stream is read from HBM.
        wg = jnp.dot(onehot, w_ref[...], preferred_element_type=jnp.float32)  # [TN, C]
    else:
        # Large-C fallback: gathered rows streamed from HBM (bf16 on the wire).
        wg = w_ref[...].astype(jnp.float32)                                   # [TN, C]

    # combined rows sum to 1, so
    #   sum_c combined * (-log_softmax(preds)) == lse + row_max - sum_c combined * preds
    # -> no [TN, C] neg-log-softmax temporary.
    combined = epsilon * wg + (1.0 - epsilon) * onehot
    per_sample = lse + row_max - jnp.sum(combined * preds, axis=-1, keepdims=True)  # [TN,1]

    def _store_partial(vals):                       # vals: [TN, 1] per-sample losses
        lane = lax.broadcasted_iota(jnp.int32, (1, 128), 1)
        out_ref[...] = jnp.where(lane == 0,
                                 jnp.sum(vals, axis=0, keepdims=True), 0.0)   # lane-dense

    last = pl.num_programs(0) - 1

    @pl.when(i < last)
    def _():
        _store_partial(per_sample)

    @pl.when(i == last)   # only the (possibly ragged) final tile pays for the mask
    def _():
        row_ids = i * block_rows + lax.broadcasted_iota(jnp.int32, (tn, 1), 0)
        _store_partial(jnp.where(row_ids < n_total, per_sample, 0.0))


def label_smoothing_cross_entropy(preds, target, matrix, *,
                                  epsilon=0.1, gamma=1.0, block_rows=512):
    """preds: [N, C] float (f32/bf16), target: [N] int, matrix: [C, C] float -> scalar f32."""
    n, c = preds.shape
    target2d = target.astype(jnp.int32).reshape(n, 1)

    # Per-class smoothing softmax is sample-independent: compute once in XLA.
    w = jax.nn.softmax(matrix.astype(jnp.float32) * (-gamma), axis=-1)        # [C, C]

    resident_w = (c * c * 4) <= _RESIDENT_W_MAX_BYTES
    stream_w_bytes = 0 if resident_w else 2 * c            # bf16 gathered rows on the wire
    resident_bytes = 2 * c * c * 4 if resident_w else 0    # assume double-buffered (safe)

    # Row-tile sizing: double-buffered input streams + ~8 B/elem of in-kernel f32
    # temporaries (one-hot, combined), against the working-set budget.
    per_row_bytes = 2 * (c * preds.dtype.itemsize + stream_w_bytes) + 8 * c
    fit_rows = max(8, (_VMEM_BUDGET_BYTES - resident_bytes) // per_row_bytes)
    limit_rows = max(8, (min(int(block_rows), int(fit_rows)) // 8) * 8)
    block_rows = n if n <= limit_rows else limit_rows       # single exact tile for small N
    num_tiles = (n + block_rows - 1) // block_rows

    if resident_w:
        w_in = w                                                              # [C, C] f32
        w_spec = pl.BlockSpec((c, c), lambda i: (0, 0))                       # DMA'd once
    else:
        # TODO(synk): class-chunked online-LSE grid axis for very large C instead of
        # streaming full rows.
        w_in = w[target2d[:, 0]].astype(jnp.bfloat16)                         # [N, C] bf16
        w_spec = pl.BlockSpec((block_rows, c), lambda i: (i, 0))

    kernel = functools.partial(
        _smooth_ce_kernel,
        epsilon=float(epsilon), n_total=n,
        block_rows=block_rows, resident_w=resident_w)

    partials = pl.pallas_call(
        kernel,
        out_shape=jax.ShapeDtypeStruct((1, 128 * num_tiles), jnp.float32),
        grid=(num_tiles,),
        in_specs=[
            pl.BlockSpec((block_rows, c), lambda i: (i, 0)),   # preds tile (native dtype)
            pl.BlockSpec((block_rows, 1), lambda i: (i, 0)),   # target ids
            w_spec,                                            # resident W or streamed rows
        ],
        out_specs=pl.BlockSpec((1, 128), lambda i: (0, i)),    # lane-dense partial sums
        compiler_params=pltpu.CompilerParams(
            dimension_semantics=("parallel",),                 # megacore-shard row tiles
            vmem_limit_bytes=_VMEM_LIMIT_BYTES,
        ),
    )(preds, target2d, w_in)

    # mean_n[eps*smoothed_n + (1-eps)*nll_n] == sum(per-tile partial sums) / N
    return jnp.sum(partials) * (1.0 / n)


def _reference(preds, target, matrix, epsilon=0.1, gamma=1.0):
    # Pure-JAX mirror of the PyTorch module.
    log_preds = jax.nn.log_softmax(preds, axis=-1)
    tw = matrix[target]                                        # [N, C]
    weights = jax.nn.softmax(tw * -gamma, axis=-1)
    loss = jnp.sum(weights * (-log_preds), axis=-1)            # [N]
    nll = jnp.mean(-jnp.take_along_axis(log_preds, target[:, None], axis=-1)[:, 0])
    return jnp.mean(epsilon * loss + (1.0 - epsilon) * nll)


if __name__ == "__main__":
    # Small shapes: N=20 samples, C=128 classes (one lane width).
    N, C = 20, 128
    key = jax.random.PRNGKey(0)
    k1, k2, k3 = jax.random.split(key, 3)

    preds = jax.random.normal(k1, (N, C), dtype=jnp.float32)
    target = jax.random.randint(k2, (N,), 0, C, dtype=jnp.int32)
    matrix = jax.random.normal(k3, (C, C), dtype=jnp.float32)

    ref = _reference(preds, target, matrix, epsilon=0.1, gamma=1.0)

    # Default tiling: N fits in a single exact tile (no ragged rows).
    out = label_smoothing_cross_entropy(preds, target, matrix, epsilon=0.1, gamma=1.0)
    out = jax.block_until_ready(out)
    assert jnp.allclose(out, ref, atol=1e-4, rtol=1e-4), (out, ref)

    # Forced tiny tiles: exercises the multi-tile grid and the pl.when-gated ragged mask.
    out_small = label_smoothing_cross_entropy(preds, target, matrix,
                                              epsilon=0.1, gamma=1.0, block_rows=8)
    out_small = jax.block_until_ready(out_small)
    assert jnp.allclose(out_small, ref, atol=1e-4, rtol=1e-4), (out_small, ref)

    print("KERNEL_OK")
</pallas_src>

<mosaic_0001>
module attributes {stable_mosaic.version = 11 : i64} {
  func.func @_smooth_ce_kernel(%arg0: i32, %arg1: memref<20x128xf32, #tpu.memory_space<vmem>>, %arg2: memref<20x1xi32, #tpu.memory_space<vmem>>, %arg3: memref<128x128xf32, #tpu.memory_space<vmem>>, %arg4: memref<1x128xf32, #tpu.memory_space<vmem>>) attributes {dimension_semantics = [#tpu.dimension_semantics<parallel>], iteration_bounds = array<i64: 1>, scalar_prefetch = 0 : i64, scratch_operands = 0 : i64, tpu.core_type = #tpu.core_type<tc>, window_params = [{transform_indices = @transform_0, window_bounds = array<i64: 20, 128>}, {transform_indices = @transform_1, window_bounds = array<i64: 20, 1>}, {pipeline_mode = #tpu.pipeline_mode<synchronous>, transform_indices = @transform_2, window_bounds = array<i64: 128, 128>}, {transform_indices = @transform_3, window_bounds = array<i64: 1, 128>}]} {
    %c0 = arith.constant 0 : index
    %c0_0 = arith.constant 0 : index
    %0 = vector.load %arg1[%c0, %c0_0] : memref<20x128xf32, #tpu.memory_space<vmem>>, vector<20x128xf32>
    %c0_1 = arith.constant 0 : index
    %c0_2 = arith.constant 0 : index
    %1 = vector.load %arg2[%c0_1, %c0_2] : memref<20x1xi32, #tpu.memory_space<vmem>>, vector<20x1xi32>
    %cst = arith.constant dense<0xFF800000> : vector<20xf32>
    %2 = vector.multi_reduction <maximumf>, %0, %cst [1] : vector<20x128xf32> to vector<20xf32>
    %3 = vector.shape_cast %2 : vector<20xf32> to vector<20x1xf32>
    %4 = vector.broadcast %3 : vector<20x1xf32> to vector<20x128xf32>
    %5 = arith.subf %0, %4 : vector<20x128xf32>
    %6 = math.exp %5 : vector<20x128xf32>
    %cst_3 = arith.constant dense<0.000000e+00> : vector<20xf32>
    %7 = vector.multi_reduction <add>, %6, %cst_3 [1] : vector<20x128xf32> to vector<20xf32>
    %8 = vector.shape_cast %7 : vector<20xf32> to vector<20x1xf32>
    %9 = math.log %8 : vector<20x1xf32>
    %10 = tpu.iota {dimensions = array<i32: 1>} : vector<20x128xi32>
    %11 = vector.broadcast %1 : vector<20x1xi32> to vector<20x128xi32>
    %12 = arith.cmpi eq, %10, %11 : vector<20x128xi32>
    %13 = arith.extui %12 : vector<20x128xi1> to vector<20x128xi32>
    %14 = arith.sitofp %13 : vector<20x128xi32> to vector<20x128xf32>
    %c0_4 = arith.constant 0 : index
    %c0_5 = arith.constant 0 : index
    %15 = vector.load %arg3[%c0_4, %c0_5] : memref<128x128xf32, #tpu.memory_space<vmem>>, vector<128x128xf32>
    %cst_6 = arith.constant dense<0.000000e+00> : vector<20x128xf32>
    %16 = tpu.matmul %14, %15, %cst_6 {dimension_numbers = #tpu.dot_dimension_numbers<[1], [0], [0], [1], [0, 0, 1, 1], [], []>} : vector<20x128xf32>, vector<128x128xf32>, vector<20x128xf32> -> vector<20x128xf32>
    %cst_7 = arith.constant 1.000000e-01 : f32
    %17 = vector.broadcast %cst_7 : f32 to vector<20x128xf32>
    %18 = arith.mulf %17, %16 : vector<20x128xf32>
    %cst_8 = arith.constant 0.899999976 : f32
    %19 = vector.broadcast %cst_8 : f32 to vector<20x128xf32>
    %20 = arith.mulf %19, %14 : vector<20x128xf32>
    %21 = arith.addf %18, %20 : vector<20x128xf32>
    %22 = arith.addf %9, %3 : vector<20x1xf32>
    %23 = arith.mulf %21, %0 : vector<20x128xf32>
    %cst_9 = arith.constant dense<0.000000e+00> : vector<20xf32>
    %24 = vector.multi_reduction <add>, %23, %cst_9 [1] : vector<20x128xf32> to vector<20xf32>
    %25 = vector.shape_cast %24 : vector<20xf32> to vector<20x1xf32>
    %26 = arith.subf %22, %25 : vector<20x1xf32>
    %c0_i32 = arith.constant 0 : i32
    %27 = arith.cmpi slt, %arg0, %c0_i32 : i32
    %28 = arith.extui %27 : i1 to i32
    %c0_i32_10 = arith.constant 0 : i32
    %29 = arith.cmpi ne, %28, %c0_i32_10 : i32
    scf.if %29 {
      %33 = tpu.iota {dimensions = array<i32: 1>} : vector<1x128xi32>
      %c0_i32_13 = arith.constant 0 : i32
      %34 = vector.broadcast %c0_i32_13 : i32 to vector<1x128xi32>
      %35 = arith.cmpi eq, %33, %34 : vector<1x128xi32>
      %cst_14 = arith.constant dense<0.000000e+00> : vector<1xf32>
      %36 = vector.multi_reduction <add>, %26, %cst_14 [0] : vector<20x1xf32> to vector<1xf32>
      %37 = vector.shape_cast %36 : vector<1xf32> to vector<1x1xf32>
      %cst_15 = arith.constant 0.000000e+00 : f32
      %38 = vector.shape_cast %37 : vector<1x1xf32> to vector<1x1xf32>
      %39 = vector.broadcast %38 : vector<1x1xf32> to vector<1x128xf32>
      %40 = vector.broadcast %cst_15 : f32 to vector<1x128xf32>
      %41 = arith.select %35, %39, %40 : vector<1x128xi1>, vector<1x128xf32>
      %c0_16 = arith.constant 0 : index
      %c0_17 = arith.constant 0 : index
      %42 = vector.load %arg4[%c0_16, %c0_17] : memref<1x128xf32, #tpu.memory_space<vmem>>, vector<1x128xf32>
      tpu.vector_store %arg4[%c0_16, %c0_17], %41 {strides = array<i32>} : memref<1x128xf32, #tpu.memory_space<vmem>>, vector<1x128xf32>,
    } else {
    }
    %c0_i32_11 = arith.constant 0 : i32
    %30 = arith.cmpi eq, %arg0, %c0_i32_11 : i32
    %31 = arith.extui %30 : i1 to i32
    %c0_i32_12 = arith.constant 0 : i32
    %32 = arith.cmpi ne, %31, %c0_i32_12 : i32
    scf.if %32 {
      %c20_i32 = arith.constant 20 : i32
      %33 = arith.muli %arg0, %c20_i32 : i32
      %34 = tpu.iota {dimensions = array<i32: 0>} : vector<20x1xi32>
      %35 = vector.broadcast %33 : i32 to vector<20x1xi32>
      %36 = arith.addi %35, %34 : vector<20x1xi32>
      %c20_i32_13 = arith.constant 20 : i32
      %37 = vector.broadcast %c20_i32_13 : i32 to vector<20x1xi32>
      %38 = arith.cmpi slt, %36, %37 : vector<20x1xi32>
      %cst_14 = arith.constant 0.000000e+00 : f32
      %39 = vector.broadcast %cst_14 : f32 to vector<20x1xf32>
      %40 = arith.select %38, %26, %39 : vector<20x1xi1>, vector<20x1xf32>
      %41 = tpu.iota {dimensions = array<i32: 1>} : vector<1x128xi32>
      %c0_i32_15 = arith.constant 0 : i32
      %42 = vector.broadcast %c0_i32_15 : i32 to vector<1x128xi32>
      %43 = arith.cmpi eq, %41, %42 : vector<1x128xi32>
      %cst_16 = arith.constant dense<0.000000e+00> : vector<1xf32>
      %44 = vector.multi_reduction <add>, %40, %cst_16 [0] : vector<20x1xf32> to vector<1xf32>
      %45 = vector.shape_cast %44 : vector<1xf32> to vector<1x1xf32>
      %cst_17 = arith.constant 0.000000e+00 : f32
      %46 = vector.shape_cast %45 : vector<1x1xf32> to vector<1x1xf32>
      %47 = vector.broadcast %46 : vector<1x1xf32> to vector<1x128xf32>
      %48 = vector.broadcast %cst_17 : f32 to vector<1x128xf32>
      %49 = arith.select %43, %47, %48 : vector<1x128xi1>, vector<1x128xf32>
      %c0_18 = arith.constant 0 : index
      %c0_19 = arith.constant 0 : index
      %50 = vector.load %arg4[%c0_18, %c0_19] : memref<1x128xf32, #tpu.memory_space<vmem>>, vector<1x128xf32>
      tpu.vector_store %arg4[%c0_18, %c0_19], %49 {strides = array<i32>} : memref<1x128xf32, #tpu.memory_space<vmem>>, vector<1x128xf32>,
    } else {
    }
    return
  }
  func.func @transform_0(%arg0: i32) -> (i32, i32) {
    %c0_i32 = arith.constant 0 : i32
    %c0_i32_0 = arith.constant 0 : i32
    return %arg0, %c0_i32 : i32, i32
  }
  func.func @transform_1(%arg0: i32) -> (i32, i32) {
    %c0_i32 = arith.constant 0 : i32
    %c0_i32_0 = arith.constant 0 : i32
    return %arg0, %c0_i32 : i32, i32
  }
  func.func @transform_2(%arg0: i32) -> (i32, i32) {
    %c0_i32 = arith.constant 0 : i32
    %c0_i32_0 = arith.constant 0 : i32
    %c0_i32_1 = arith.constant 0 : i32
    return %c0_i32, %c0_i32_0 : i32, i32
  }
  func.func @transform_3(%arg0: i32) -> (i32, i32) {
    %c0_i32 = arith.constant 0 : i32
    %c0_i32_0 = arith.constant 0 : i32
    return %c0_i32, %arg0 : i32, i32
  }
}

</mosaic_0001>

<bundles_post_ra>
// kernel: tpu_custom_call.1
= control target key start
LH: loop header
LB: loop body
LE: loop exit
PB: predicated region body
PF: predicated region fallthrough
CT: control target
= control target key end

     0   :  { %8 = vsyncpa [#allocation3], 0  ;;  %s670_s0 = inlined_call_operand.hbm [shape: f32[20,128], index: 0, kind: input, shape index: {}]   ;;  %s671_s1 = inlined_call_operand.hbm [shape: s32[20,1], index: 1, kind: input, shape index: {}]   ;;  %s672_s2 = inlined_call_operand.hbm [shape: f32[128,128], index: 2, kind: input, shape index: {}]   ;;  %s673_s3 = inlined_call_operand.hbm [shape: f32[1,128], index: 3, kind: output, shape index: {}]  }
   0x1   :  { %9 = vsyncpa [#allocation6], 0 }
   0x2   :  { %10 = vsyncpa [#allocation4], 0  ;;  %s521_s12 = smov [#allocation5]   ;;  %s522_s14 = smov [#allocation2]  }
   0x3   :  { %s28_s13 = sshll.u32 %s521_s12, 4  ;;  %s16_s15 = sshll.u32 %s522_s14, 4  ;;  %s29_s13 = int_to_ptr.vmem [resolvable:$true] %s28_s13  ;;  %s552_s15 = int_to_ptr.vmem [resolvable:$true] %s16_s15 }
   0x4   :  { %s427_s18 = scalar_lea.hbm %s671_s1, 384 }
   0x5   :  { %p428_p0 = scmp.ne.s32.totalorder %s671_s1, %s427_s18  ;;  %p431_p1 = scmp.lt.u32.totalorder %s427_s18, %s671_s1 }
   0x7   :  { %p433_p2 = pnand %p431_p1, %p428_p0 }
   0x9   :  { %436 = shalt.err (!%p433_p2)
}
   0xa   :  { %s437_s23 = scalar_lea.vmem %s29_s13, 384  ;;  %p442_p4 = scmp.lt.s32.totalorder %s29_s13, %s29_s13 }
   0xb   :  { %p438_p3 = scmp.ne.s32.totalorder %s29_s13, %s437_s23  ;;  %p443_p5 = scmp.lt.s32.totalorder %s437_s23, %s437_s23 }
   0xd   :  { %p444_p6 = por %p443_p5, %p442_p4 }
   0xf   :  { %p445_p7 = pnand %p444_p6, %p438_p3 }
  0x11   :  { %448 = shalt.err (!%p445_p7)
}
  0x12   :  { %s523_s24 = smov 128   ;;  %s524_s25 = smov 8  }
  0x13   :  { %34 = dma.hbm_to_vmem [thread:$0]  %s671_s1, 384, %s29_s13, [#allocation6], %s523_s24, %s523_s24, %s524_s25  }
  0x14   :  { %s449_s30 = scalar_lea.hbm %s670_s0, 384 }
  0x15   :  { %p450_p8 = scmp.ne.s32.totalorder %s670_s0, %s449_s30  ;;  %p453_p9 = scmp.lt.u32.totalorder %s449_s30, %s670_s0 }
  0x17   :  { %p455_p10 = pnand %p453_p9, %p450_p8 }
  0x19   :  { %458 = shalt.err (!%p455_p10)
}
  0x1a   :  { %s459_s8 = scalar_lea.vmem %s552_s15, 384  ;;  %p464_p12 = scmp.lt.s32.totalorder %s552_s15, %s552_s15 }
  0x1b   :  { %p460_p11 = scmp.ne.s32.totalorder %s552_s15, %s459_s8  ;;  %p465_p13 = scmp.lt.s32.totalorder %s459_s8, %s459_s8 }
  0x1d   :  { %p466_p0 = por %p465_p13, %p464_p12 }
  0x1f   :  { %p467_p1 = pnand %p466_p0, %p460_p11 }
  0x21   :  { %470 = shalt.err (!%p467_p1)
}
  0x22   :  { %22 = dma.hbm_to_vmem [thread:$0]  %s670_s0, 384, %s552_s15, [#allocation3], %s523_s24, %s523_s24, %s524_s25  }
  0x23   :  { %s525_s10 = smov [#allocation7]   ;;  %s471_s14 = scalar_lea.hbm %s672_s2, 2048 }
  0x24   :  { %s40_s11 = sshll.u32 %s525_s10, 4  ;;  %p472_p2 = scmp.ne.s32.totalorder %s672_s2, %s471_s14  ;;  %s41_s11 = int_to_ptr.vmem [resolvable:$true] %s40_s11 }
  0x25   :  { %p475_p3 = scmp.lt.u32.totalorder %s471_s14, %s672_s2 }
  0x27   :  { %p477_p4 = pnand %p475_p3, %p472_p2 }
  0x29   :  { %480 = shalt.err (!%p477_p4)
}
  0x2a   :  { %s481_s20 = scalar_lea.vmem %s41_s11, 2048  ;;  %p486_p6 = scmp.lt.s32.totalorder %s41_s11, %s41_s11 }
  0x2b   :  { %p482_p5 = scmp.ne.s32.totalorder %s41_s11, %s481_s20  ;;  %p487_p7 = scmp.lt.s32.totalorder %s481_s20, %s481_s20 }
  0x2d   :  { %p488_p8 = por %p487_p7, %p486_p6 }
  0x2f   :  { %p489_p9 = pnand %p488_p8, %p482_p5 }
  0x31   :  { %492 = shalt.err (!%p489_p9)
}
  0x32   :  { %46 = dma.hbm_to_vmem [thread:$0]  %s672_s2, 2048, %s41_s11, [#allocation6], %s523_s24, %s523_s24, %s524_s25  }
  0x33   :  { %515 = dma.done.wait [#allocation3], 384  }
  0x34   :  { %516 = vsyncadd [#allocation3], 4294966912 }
  0x35   :  { %517 = dma.done.wait [#allocation6], 2432  }
  0x36   :  { %518 = vsyncadd [#allocation6], 4294964864  ;;  %v526_v0 = vmov 0   ;;  %v527_v1 = vmov 0.0|0.0   ;;  %v60_v2 = vld [vmem:[#allocation5 + $0x8] sm:$0xff]  ;;  %v59_v3 = vld [vmem:[#allocation5] sm:$0xff]  ;;  %v92_v34 = vlaneseq }
  0x37   :  { %414 = vset.pattern.permute.xlu1 %v526_v0  ;;  %413 = vset.pattern.permute.xlu0 %v526_v0  ;;  %v61_v4 = vld [vmem:[#allocation5 + $0x10] sm:$0xf]  ;;  %v112_v5 = vld [vmem:[#allocation7] sm:$0xff]  ;;  %v113_v6 = vld [vmem:[#allocation7 + $0x8] sm:$0xff]  ;;  %vm528_vm0 = vmmov 0   ;;  %v529_v8 = vmov 0.0  }
  0x38   :  { %362 = vmatprep.subr.bf16.mxu0 %v527_v1  ;;  %386 = vmatprep.subr.bf16.mxu1 %v527_v1  ;;  %v114_v7 = vld [vmem:[#allocation7 + $0x10] sm:$0xff]  ;;  %v363_v9 = vpack.c.bf16 %v113_v6, %v112_v5  ;;  %v115_v10 = vld [vmem:[#allocation7 + $0x18] sm:$0xff]  ;;  %v116_v12 = vld [vmem:[#allocation7 + $0x20] sm:$0xff]  ;;  %vm66_vm1 = vcmask 1043456   ;;  %v629_v35 = vand.u32 127, %v92_v34  ;;  %v530_v38 = vmov 1.0  }
  0x39   :  { %98 = vperm.xlu0 %413, %v60_v2   ;;  %95 = vperm.xlu1 %414, %v59_v3   ;;  %v366_v11 = vpack.c.bf16 %v115_v10, %v114_v7  ;;  %v117_v13 = vld [vmem:[#allocation7 + $0x28] sm:$0xff]  ;;  %v118_v15 = vld [vmem:[#allocation7 + $0x30] sm:$0xff]  ;;  %v119_v16 = vld [vmem:[#allocation7 + $0x38] sm:$0xff]  ;;  %s531_s2 = smov [#allocation8]  }
  0x3a   :  { %353 = vmatprep.mubr.msk.f32.mxu0 %vm528_vm0, %v529_v8  ;;  %356 = vmatprep.mubr.msk.f32.mxu1 %vm528_vm0, %v529_v8  ;;  %v369_v14 = vpack.c.bf16 %v117_v13, %v116_v12  ;;  %v372_v17 = vpack.c.bf16 %v119_v16, %v118_v15  ;;  %v120_v18 = vld [vmem:[#allocation7 + $0x40] sm:$0xff]  ;;  %v121_v19 = vld [vmem:[#allocation7 + $0x48] sm:$0xff]  ;;  %v122_v21 = vld [vmem:[#allocation7 + $0x50] sm:$0xff]  ;;  %s286_s21 = sshll.u32 %s531_s2, 4  ;;  %vm268_vm6 = vcmp.eq.s32.totalorder %v629_v35, 0  ;;  %s287_s21 = int_to_ptr.vmem [resolvable:$true] %s286_s21 }
  0x3b   :  { %364 = vmatpush3.bf16.msra.mxu0 %v363_v9  ;;  %394 = vmatpush3.bf16.msra.mxu1 %v363_v9  ;;  %v375_v20 = vpack.c.bf16 %v121_v19, %v120_v18  ;;  %v123_v22 = vld [vmem:[#allocation7 + $0x58] sm:$0xff]  ;;  %v124_v24 = vld [vmem:[#allocation7 + $0x60] sm:$0xff]  ;;  %v125_v25 = vld [vmem:[#allocation7 + $0x68] sm:$0xff]  ;;  %s493_s22 = scalar_lea.vmem %s287_s21, 16  ;;  %s497_s23 = scalar_lea.vmem %s287_s21, 32 }
  0x3c   :  { %365 = vmatprep.subr.bf16.mxu0 %v527_v1  ;;  %387 = vmatprep.subr.bf16.mxu1 %v527_v1  ;;  %v378_v23 = vpack.c.bf16 %v123_v22, %v122_v21  ;;  %v381_v26 = vpack.c.bf16 %v125_v25, %v124_v24  ;;  %v126_v27 = vld [vmem:[#allocation7 + $0x70] sm:$0xff]  ;;  %v127_v28 = vld [vmem:[#allocation7 + $0x78] sm:$0xff]  ;;  %v623_v30 = vld [vmem:[#allocation2 + $0x10] sm:$0xf]  ;;  %p494_p10 = scmp.ne.s32.totalorder %s287_s21, %s493_s22  ;;  %p498_p11 = scmp.lt.s32.totalorder %s287_s21, %s287_s21 }
  0x3d   :  { %101 = vperm.xlu0 %413, %v61_v4   ;;  %v384_v29 = vpack.c.bf16 %v127_v28, %v126_v27  ;;  %v56_v31 = vld [vmem:[#allocation2] sm:$0xff]  ;;  %v67_v32 = vsel %vm66_vm1, %v623_v30, -inf  ;;  %v57_v33 = vld [vmem:[#allocation2 + $0x8] sm:$0xff]  ;;  %p499_p12 = scmp.lt.s32.totalorder %s497_s23, %s493_s22 }
  0x3f   :  { %367 = vmatpush3.bf16.msra.mxu0 %v366_v11  ;;  %395 = vmatpush3.bf16.msra.mxu1 %v366_v11  ;;  %p500_p13 = por %p499_p12, %p498_p11 }
  0x40   :  { %368 = vmatprep.subr.bf16.mxu0 %v527_v1  ;;  %388 = vmatprep.subr.bf16.mxu1 %v527_v1 }
  0x41   :  { %p501_p0 = pnand %p500_p13, %p494_p10 }
  0x43   :  { %370 = vmatpush3.bf16.msra.mxu0 %v369_v14  ;;  %396 = vmatpush3.bf16.msra.mxu1 %v369_v14 }
  0x44   :  { %371 = vmatprep.subr.bf16.mxu0 %v527_v1  ;;  %389 = vmatprep.subr.bf16.mxu1 %v527_v1 }
  0x47   :  { %373 = vmatpush3.bf16.msra.mxu0 %v372_v17  ;;  %397 = vmatpush3.bf16.msra.mxu1 %v372_v17  ;;  %v255_v17 = vshrl.u32 %v92_v34, 7 }
  0x48   :  { %374 = vmatprep.subr.bf16.mxu0 %v527_v1  ;;  %390 = vmatprep.subr.bf16.mxu1 %v527_v1 }
  0x4b   :  { %376 = vmatpush3.bf16.msra.mxu0 %v375_v20  ;;  %398 = vmatpush3.bf16.msra.mxu1 %v375_v20 }
  0x4c   :  { %377 = vmatprep.subr.bf16.mxu0 %v527_v1  ;;  %391 = vmatprep.subr.bf16.mxu1 %v527_v1 }
  0x4f   :  { %379 = vmatpush3.bf16.msra.mxu0 %v378_v23  ;;  %399 = vmatpush3.bf16.msra.mxu1 %v378_v23  ;;  %v257_v23 = vadd.s32 16, %v255_v17 }
  0x50   :  { %380 = vmatprep.subr.bf16.mxu0 %v527_v1  ;;  %392 = vmatprep.subr.bf16.mxu1 %v527_v1 }
  0x51   :  { %vm264_vm5 = vcmp.lt.s32.totalorder %v257_v23, 20 }
  0x53   :  { %382 = vmatpush3.bf16.msra.mxu0 %v381_v26  ;;  %400 = vmatpush3.bf16.msra.mxu1 %v381_v26 }
  0x54   :  { %383 = vmatprep.subr.bf16.mxu0 %v527_v1  ;;  %393 = vmatprep.subr.bf16.mxu1 %v527_v1 }
  0x57   :  { %385 = vmatpush3.bf16.msra.mxu0 %v384_v29  ;;  %401 = vmatpush3.bf16.msra.mxu1 %v384_v29 }
  0x5c   :  { %62 = vmax.xlane.f32.xlu0 %v56_v31 }
  0x5d   :  { %68 = vmax.xlane.f32.xlu1 %v67_v32 }
  0x60   :  { %64 = vmax.xlane.f32.xlu0 %v57_v33 }
  0xb8   :  { %v99_v36 = vpop.permute.xlu0 %98  ;;  %v96_v37 = vpop.permute.xlu1 %95 }
  0xb9   :  { %vm104_vm2 = vcmp.eq.s32.totalorder %v629_v35, %v99_v36  ;;  %vm103_vm3 = vcmp.eq.s32.totalorder %v629_v35, %v96_v37 }
  0xba   :  { %354 = vmatmul.mubr.msk.f32.vlgmr.msra.gmra.mrb[0].mxu0 %vm103_vm3, %v530_v38  ;;  %357 = vmatmul.mubr.msk.f32.vlgmr.msra.gmra.mrb[0].mxu1 %vm104_vm2, %v530_v38  ;;  %v297_v53 = vsel %vm104_vm2, 1.0, %v529_v8  ;;  %v296_v54 = vsel %vm103_vm3, 1.0, %v529_v8 }
  0xbb   :  { %359 = vmatprep.mubr.msk.f32.mxu1 %vm528_vm0, %v529_v8  ;;  %v212_v55 = vmul.f32 0.9, %v297_v53  ;;  %v211_v56 = vmul.f32 0.9, %v296_v54 }
  0xbc   :  { %v102_v39 = vpop.permute.xlu0 %101 }
  0xbd   :  { %vm105_vm4 = vcmp.eq.s32.totalorder %v629_v35, %v102_v39 }
  0xbe   :  { %360 = vmatmul.mubr.msk.f32.gmra.mrb[2].mxu1 %vm105_vm4, %v530_v38  ;;  %v298_v63 = vsel %vm105_vm4, 1.0, %v529_v8 }
  0xbf   :  { %v213_v3 = vmul.f32 0.9, %v298_v63 }
  0xe9   :  { %v63_v40 = vpop.xlane.xlu0 %62 }
  0xea   :  { %v70_v41 = vsub.f32 %v56_v31, %v63_v40  ;;  %v69_v42 = vpop.xlane.xlu1 %68 }
  0xeb   :  { %v72_v43 = vsub.f32 %v623_v30, %v69_v42 }
  0xec   :  { %v73_v44 = vmul.f32 1.442695, %v70_v41 }
  0xed   :  { %v77_v45 = vmul.f32 1.442695, %v72_v43  ;;  %v65_v46 = vpop.xlane.xlu0 %64 }
  0xee   :  { %415 = vpow2.f32 %v73_v44  ;;  %v71_v47 = vsub.f32 %v57_v33, %v65_v46 }
  0xef   :  { %417 = vpow2.f32 %v77_v45 }
  0xf0   :  { %v75_v48 = vmul.f32 1.442695, %v71_v47 }
  0xf2   :  { %419 = vpow2.f32 %v75_v48 }
  0xf8   :  { %v416_v49 = vpop.eup %415 }
  0xf9   :  { %v418_v50 = vpop.eup %417  ;;  %79 = vadd.xlane.f32.xlu1 %v416_v49 }
  0xfa   :  { %v83_v51 = vsel %vm66_vm1, %v418_v50, 0.0 }
  0xfc   :  { %v420_v52 = vpop.eup %419 }
  0xfd   :  { %84 = vadd.xlane.f32.xlu1 %v83_v51  ;;  %81 = vadd.xlane.f32.xlu0 %v420_v52 }
 0x186   :  { %v80_v12 = vpop.xlane.xlu1 %79 }
 0x187   :  { %421 = vlog2.f32 %v80_v12 }
 0x18a   :  { %v82_v13 = vpop.xlane.xlu0 %81  ;;  %v85_v8 = vpop.xlane.xlu1 %84 }
 0x18b   :  { %423 = vlog2.f32 %v82_v13 }
 0x18c   :  { %425 = vlog2.f32 %v85_v8 }
 0x18d   :  { %v194_v57 = vpop.f32.mrb[0].mxu0  ;;  %v199_v58 = vpop.f32.mrb[0].mxu1 }
 0x18e   :  { %v208_v59 = vmul.f32 0.1, %v194_v57  ;;  %v209_v60 = vmul.f32 0.1, %v199_v58  ;;  %v355_v61 = vpop.f32.mrb[1].mxu0  ;;  %v358_v62 = vpop.f32.mrb[1].mxu1 }
 0x190   :  { %v214_v0 = vadd.f32 %v211_v56, %v208_v59  ;;  %v215_v1 = vadd.f32 %v212_v55, %v209_v60 }
 0x191   :  { %v204_v2 = vpop.f32.mrb[2].mxu1  ;;  %v422_v14 = vpop.eup %421 }
 0x192   :  { %v210_v4 = vmul.f32 0.1, %v204_v2  ;;  %v361_v5 = vpop.f32.mrb[3].mxu1  ;;  %v221_v6 = vmul.f32 %v215_v1, %v57_v33  ;;  %v220_v7 = vmul.f32 %v214_v0, %v56_v31  ;;  %v87_v18 = vmul.f32 0.6931472, %v422_v14 }
 0x194   :  { %v216_v9 = vadd.f32 %v213_v3, %v210_v4  ;;  %225 = vadd.xlane.f32.xlu1 %v221_v6  ;;  %223 = vadd.xlane.f32.xlu0 %v220_v7  ;;  %v217_v25 = vadd.f32 %v87_v18, %v63_v40 }
 0x195   :  { %v424_v15 = vpop.eup %423 }
 0x196   :  { %v222_v10 = vmul.f32 %v216_v9, %v623_v30  ;;  %v426_v16 = vpop.eup %425  ;;  %v89_v19 = vmul.f32 0.6931472, %v424_v15 }
 0x197   :  { %v91_v20 = vmul.f32 0.6931472, %v426_v16 }
 0x198   :  { %v227_v11 = vsel %vm66_vm1, %v222_v10, 0.0  ;;  %v218_v24 = vadd.f32 %v89_v19, %v65_v46 }
 0x199   :  { %228 = vadd.xlane.f32.xlu0 %v227_v11  ;;  %v219_v28 = vadd.f32 %v91_v20, %v69_v42 }
 0x221   :  { %v224_v21 = vpop.xlane.xlu0 %223  ;;  %v226_v22 = vpop.xlane.xlu1 %225 }
 0x222   :  { %v231_v26 = vsub.f32 %v218_v24, %v226_v22  ;;  %v230_v27 = vsub.f32 %v217_v25, %v224_v21 }
 0x224   :  { %v269_v31 = vadd.f32 %v231_v26, %v230_v27 }
 0x226   :  { %v229_v29 = vpop.xlane.xlu0 %228 }
 0x227   :  { %v232_v30 = vsub.f32 %v219_v28, %v229_v29 }
 0x229   :  { %v267_v32 = vsel %vm264_vm5, %v232_v30, 0.0 }
 0x22a   :  { %v270_v33 = vsel %vm66_vm1, %v267_v32, 0.0 }
 0x22b   :  { %v271_v36 = vadd.f32 %v270_v33, %v269_v31 }
 0x22d   :  { %v272_v34 = vrot.slane %v271_v36, 4 }
 0x22f   :  { %v273_v37 = vadd.f32 %v272_v34, %v271_v36 }
 0x231   :  { %v274_v38 = vrot.slane %v273_v37, 2 }
 0x233   :  { %v275_v39 = vadd.f32 %v274_v38, %v273_v37 }
 0x235   :  { %v276_v41 = vrot.slane %v275_v39, 1 }
 0x237   :  { %v277_v40 = vadd.f32 %v276_v41, %v275_v39 }
 0x239   :  { %v278_v42 = vsel %vm268_vm6, %v277_v40, 0.0 }
 0x23a   :  { %279 = vst [vmem:[#allocation8] sm:$0x1] %v278_v42 }
 0x23b   :  { %504 = shalt.err (!%p501_p0)
}
 0x23c   :  { %s505_s26 = scalar_lea.hbm %s673_s3, 16 }
 0x23d   :  { %p506_p1 = scmp.ne.s32.totalorder %s673_s3, %s505_s26  ;;  %p509_p2 = scmp.lt.u32.totalorder %s505_s26, %s673_s3 }
 0x23f   :  { %p511_p3 = pnand %p509_p2, %p506_p1 }
 0x241   :  { %514 = shalt.err (!%p511_p3)
}
 0x242   :  { %289 = dma.vmem_to_hbm [thread:$0]  %s287_s21, 16, %s673_s3, [#allocation4]  }
 0x243   :  { %519 = dma.done.wait [#allocation4], 16  }
 0x244   :  { %520 = vsyncadd [#allocation4], 4294967280 }
 0x245   :  { %293 = vsyncpa [#allocation3], 1 }
 0x246   :  { %294 = vsyncpa [#allocation6], 1 }
 0x247   :  { %295 = vsyncpa [#allocation4], 1 }

</bundles_post_ra>
